<compile_context>
chip_gen: v6e
topology: v6e:2x2x1
jax: 0.10.0
libtpu: 0.0.40
codegen_flags: <defaults>
</compile_context>

<pallas_src>
import functools

import jax
import jax.numpy as jnp
from jax import lax
from jax.experimental import pallas as pl
from jax.experimental.pallas import tpu as pltpu


def _round_up(x, m):
    return ((x + m - 1) // m) * m


def _vmem_capacity_bytes():
    try:
        return int(pltpu.get_tpu_info().vmem_capacity_bytes)
    except Exception:
        return 128 * 1024 * 1024


# ---------------------------------------------------------------------------
# Stage 1: value network (Linear(F, 1)) on the MXU, tiled over rows of [B*T, F]
# ---------------------------------------------------------------------------
def _value_net_kernel(obs_ref, nobs_ref, w_ref, bias_ref, v_ref, nv_ref):
    w = w_ref[...]                                              # [F, 1]
    bias = bias_ref[0]                                          # folded here (free VPU filler)
    v_ref[...] = jnp.dot(obs_ref[...], w, preferred_element_type=jnp.float32) + bias
    nv_ref[...] = jnp.dot(nobs_ref[...], w, preferred_element_type=jnp.float32) + bias


def _pick_row_tile(n_rows, feat, itemsize):
    """Chip-aware row tile + scoped-VMEM limit for the stage-1 stream."""
    vmem_cap = _vmem_capacity_bytes()
    # v7x (64 MiB VMEM, ~3.2 TB/s HBM) wants bigger blocks to amortize the
    # ~0.35 us per-grid-step overhead; v5e/v6e (128 MiB VMEM) use ~4 MiB/input.
    per_input = (6 << 20) if vmem_cap <= (64 << 20) else (4 << 20)
    align = 16 if itemsize == 2 else 8            # bf16 packs (16, 128) per vreg
    tm = max(align, per_input // max(1, feat * itemsize))
    tm = max(align, (tm // align) * align)
    if tm >= 128:                                 # MXU/packing friendly granularity
        tm = (tm // 128) * 128
    if n_rows <= tm:
        tm = _round_up(n_rows, align)
    # 2 inputs + 2 (tiny) outputs, each double-buffered by the pipeline.
    resident = 4 * tm * feat * itemsize + 16 * tm
    vmem_limit = int(min(resident + (16 << 20), 48 << 20))
    return tm, vmem_limit


def _value_network(obs2d, nobs2d, w_col, bias1):
    n_rows, feat = obs2d.shape
    itemsize = jnp.dtype(obs2d.dtype).itemsize
    tm, vmem_limit = _pick_row_tile(n_rows, feat, itemsize)
    r_pad = _round_up(n_rows, tm)
    if r_pad != n_rows:
        # Only hit when tm does not divide B*T (padding copies the big tensors).
        pad = r_pad - n_rows
        obs2d = jnp.pad(obs2d, ((0, pad), (0, 0)))
        nobs2d = jnp.pad(nobs2d, ((0, pad), (0, 0)))

    cost = pl.CostEstimate(
        flops=4 * r_pad * feat,
        transcendentals=0,
        bytes_accessed=int(2 * r_pad * feat * itemsize + feat * itemsize + 8 * r_pad),
    )

    v_col, nv_col = pl.pallas_call(
        _value_net_kernel,
        out_shape=(
            jax.ShapeDtypeStruct((r_pad, 1), jnp.float32),
            jax.ShapeDtypeStruct((r_pad, 1), jnp.float32),
        ),
        grid=(r_pad // tm,),
        in_specs=[
            pl.BlockSpec((tm, feat), lambda i: (i, 0)),          # obs rows
            pl.BlockSpec((tm, feat), lambda i: (i, 0)),          # next_obs rows
            pl.BlockSpec((feat, 1), lambda i: (0, 0)),           # weight column
            pl.BlockSpec(memory_space=pltpu.MemorySpace.SMEM),   # bias (1,)
        ],
        out_specs=(
            pl.BlockSpec((tm, 1), lambda i: (i, 0)),
            pl.BlockSpec((tm, 1), lambda i: (i, 0)),
        ),
        compiler_params=pltpu.CompilerParams(
            dimension_semantics=("parallel",),
            vmem_limit_bytes=vmem_limit,
        ),
        cost_estimate=cost,
    )(obs2d, nobs2d, w_col, bias1)
    return v_col[:n_rows, 0], nv_col[:n_rows, 0]


# ---------------------------------------------------------------------------
# Stage 2: TD(lambda) reverse scan, batch-tiled, register-resident doubling scan
# ---------------------------------------------------------------------------
def _td_lambda_scan_kernel(gamma, lmbda,
                           v_ref, nv_ref, r_ref, d_ref,
                           adv_ref, vt_ref):
    T = v_ref.shape[-1]
    v = v_ref[...]
    nv = nv_ref[...]
    nd = 1.0 - d_ref[...]                      # not_done computed in-kernel
    r = r_ref[...]

    # returns_t = a_t * returns_{t+1} + b_t
    a = (gamma * lmbda) * nd
    b = r + (gamma * (1.0 - lmbda)) * nd * nv

    # Fold the boundary carry (g_T := next_value[T-1]) into the last step so
    # every completed suffix chain carries a == 0.
    t_idx = lax.broadcasted_iota(jnp.int32, a.shape, dimension=1)
    last = t_idx == (T - 1)
    b = jnp.where(last, b + a * nv, b)
    a = jnp.where(last, 0.0, a)

    # ceil(log2(T))-step doubling of the linear recurrence, fully
    # register-resident (no VMEM halo scratch, no per-step vector loads/stores
    # of carries).  No masking is needed: any position whose shifted partner
    # is out of range / wrapped already has a == 0, so the garbage partner is
    # multiplied by zero.
    lane_aligned = (T % 128 == 0)
    d = 1
    while d < T:
        if lane_aligned:
            # XLU lane rotation (free slot): shifted[:, t] = x[:, (t + d) % T].
            a_s = pltpu.roll(a, shift=T - d, axis=1)
            b_s = pltpu.roll(b, shift=T - d, axis=1)
        else:
            # T not a multiple of 128: realize the shift on the (idle) MXU with
            # a 0/1 shift matrix; columns past T-d are all-zero (= scan identity).
            rows = lax.broadcasted_iota(jnp.int32, (T, T), 0)
            cols = lax.broadcasted_iota(jnp.int32, (T, T), 1)
            shift_mat = (rows == cols + d).astype(a.dtype)
            a_s = jnp.dot(a, shift_mat, preferred_element_type=jnp.float32)
            b_s = jnp.dot(b, shift_mat, preferred_element_type=jnp.float32)
        b = b + a * b_s
        a = a * a_s
        d *= 2

    adv_ref[...] = b - v
    vt_ref[...] = b                             # value_target == returns


def _pick_batch_tile(batch, T):
    # Keep the ~6 live [TB, T] f32 arrays of the scan comfortably inside the
    # 64-vreg register file (~4K f32 elements per array).
    tb = max(8, ((4096 // max(1, T)) // 8) * 8)
    tb = min(tb, 512)
    tb = min(tb, _round_up(batch, 8))
    return max(8, tb)


# ---------------------------------------------------------------------------
# Wrapper
# ---------------------------------------------------------------------------
def td_lambda_estimate(obs, next_obs, reward, done, weight, bias,
                       gamma=0.98, lmbda=0.94, average_rewards=False):
    """obs/next_obs: [B, T, F]; reward: [B, T, 1]; done: [B, T, 1] (bool).

    Returns (advantage, value_target), each [B, T, 1] float32.
    """
    B, T, F = obs.shape

    compute_dtype = jnp.bfloat16 if obs.dtype == jnp.bfloat16 else jnp.float32
    reward = reward.astype(jnp.float32)
    if average_rewards:
        # TODO(synk): torch's .std() is the unbiased (ddof=1) estimator.
        reward = reward - reward.mean()
        reward = reward / jnp.maximum(jnp.std(reward), 1e-4)

    # Stage 1: flat row-major [B*T, F] view (free reshape, no transposes).
    n_rows = B * T
    obs2d = obs.reshape(n_rows, F).astype(compute_dtype)
    nobs2d = next_obs.reshape(n_rows, F).astype(compute_dtype)
    w_col = weight.reshape(F, 1).astype(compute_dtype)   # torch Linear(F,1) weight is [1,F]
    bias1 = bias.reshape(1).astype(jnp.float32)
    v_flat, nv_flat = _value_network(obs2d, nobs2d, w_col, bias1)

    # Stage 2 inputs, [B, T] with time on the lane axis (cheap reshapes of the
    # small per-step arrays only).
    v_bt = v_flat.reshape(B, T)
    nv_bt = nv_flat.reshape(B, T)
    r_bt = reward[..., 0]
    # done kept as a f32 flag; not_done is computed in-kernel.
    d_bt = done[..., 0].astype(jnp.float32)

    tb = _pick_batch_tile(B, T)
    b_pad = _round_up(B, tb)
    if b_pad != B:
        pad = ((0, b_pad - B), (0, 0))
        v_bt = jnp.pad(v_bt, pad)
        nv_bt = jnp.pad(nv_bt, pad)
        r_bt = jnp.pad(r_bt, pad)
        d_bt = jnp.pad(d_bt, pad)

    kernel = functools.partial(_td_lambda_scan_kernel, float(gamma), float(lmbda))
    adv_bt, vt_bt = pl.pallas_call(
        kernel,
        out_shape=(
            jax.ShapeDtypeStruct((b_pad, T), jnp.float32),
            jax.ShapeDtypeStruct((b_pad, T), jnp.float32),
        ),
        grid=(b_pad // tb,),
        in_specs=[
            pl.BlockSpec((tb, T), lambda i: (i, 0)),   # value
            pl.BlockSpec((tb, T), lambda i: (i, 0)),   # next_value
            pl.BlockSpec((tb, T), lambda i: (i, 0)),   # reward
            pl.BlockSpec((tb, T), lambda i: (i, 0)),   # done flag
        ],
        out_specs=(
            pl.BlockSpec((tb, T), lambda i: (i, 0)),
            pl.BlockSpec((tb, T), lambda i: (i, 0)),
        ),
        compiler_params=pltpu.CompilerParams(
            dimension_semantics=("parallel",)),
    )(v_bt, nv_bt, r_bt, d_bt)

    advantage = adv_bt[:B, :, None]                # [B, T, 1]
    value_target = vt_bt[:B, :, None]              # [B, T, 1]
    return advantage, value_target


# ---------------------------------------------------------------------------
# Pure-JAX reference (same semantics as torchrl td_lambda_advantage_estimate)
# ---------------------------------------------------------------------------
def _reference(obs, next_obs, reward, done, weight, bias, gamma, lmbda):
    w = weight.reshape(-1)
    v = jnp.einsum('btf,f->bt', obs, w) + bias[0]
    nv = jnp.einsum('btf,f->bt', next_obs, w) + bias[0]
    r = reward[..., 0]
    nd = 1.0 - done[..., 0].astype(jnp.float32)
    T = r.shape[1]
    g = nv[:, -1]
    rets = []
    for t in reversed(range(T)):
        g = r[:, t] + gamma * nd[:, t] * ((1.0 - lmbda) * nv[:, t] + lmbda * g)
        rets.append(g)
    returns = jnp.stack(rets[::-1], axis=1)
    adv = returns - v
    return adv[..., None], (adv + v)[..., None]


if __name__ == "__main__":
    B, T, F = 8, 16, 32
    gamma, lmbda = 0.98, 0.94

    key = jax.random.PRNGKey(0)
    k_obs, k_nobs, k_rew, k_done, k_w, k_b = jax.random.split(key, 6)

    obs = jax.random.normal(k_obs, (B, T, F), dtype=jnp.float32)
    next_obs = jax.random.normal(k_nobs, (B, T, F), dtype=jnp.float32)
    reward = jax.random.normal(k_rew, (B, T, 1), dtype=jnp.float32)
    done = jax.random.bernoulli(k_done, 0.1, (B, T, 1))

    # Deterministic value-network params: nn.Linear(F, 1) -> weight [1, F], bias [1]
    bound = 1.0 / jnp.sqrt(F)
    weight = jax.random.uniform(k_w, (1, F), jnp.float32, -bound, bound)
    bias = jax.random.uniform(k_b, (1,), jnp.float32, -bound, bound)

    adv, vt = td_lambda_estimate(obs, next_obs, reward, done, weight, bias,
                                 gamma=gamma, lmbda=lmbda)
    jax.block_until_ready((adv, vt))

    adv_ref, vt_ref = _reference(obs, next_obs, reward, done, weight, bias,
                                 gamma, lmbda)
    assert adv.shape == (B, T, 1) and vt.shape == (B, T, 1)
    assert jnp.allclose(adv, adv_ref, atol=1e-4, rtol=1e-4)
    assert jnp.allclose(vt, vt_ref, atol=1e-4, rtol=1e-4)

    # TODO(synk): torchrl's `vectorized=True` path uses a conv1d-based formulation;
    # this kernel implements the mathematically equivalent linear recurrence.
    print("KERNEL_OK")
</pallas_src>

<mosaic_0001>
module attributes {stable_mosaic.version = 11 : i64} {
  func.func @_value_net_kernel(%arg0: i32, %arg1: memref<128x32xf32, #tpu.memory_space<vmem>>, %arg2: memref<128x32xf32, #tpu.memory_space<vmem>>, %arg3: memref<32x1xf32, #tpu.memory_space<vmem>>, %arg4: memref<1xf32, #tpu.memory_space<smem>>, %arg5: memref<128x1xf32, #tpu.memory_space<vmem>>, %arg6: memref<128x1xf32, #tpu.memory_space<vmem>>) attributes {dimension_semantics = [#tpu.dimension_semantics<parallel>], iteration_bounds = array<i64: 1>, scalar_prefetch = 0 : i64, scratch_operands = 0 : i64, tpu.core_type = #tpu.core_type<tc>, window_params = [{transform_indices = @transform_0, window_bounds = array<i64: 128, 32>}, {transform_indices = @transform_1, window_bounds = array<i64: 128, 32>}, {pipeline_mode = #tpu.pipeline_mode<synchronous>, transform_indices = @transform_2, window_bounds = array<i64: 32, 1>}, {transform_indices = @transform_3, window_bounds = array<i64: 1>}, {transform_indices = @transform_4, window_bounds = array<i64: 128, 1>}, {transform_indices = @transform_5, window_bounds = array<i64: 128, 1>}]} {
    %c0 = arith.constant 0 : index
    %c0_0 = arith.constant 0 : index
    %0 = vector.load %arg3[%c0, %c0_0] : memref<32x1xf32, #tpu.memory_space<vmem>>, vector<32x1xf32>
    %c0_1 = arith.constant 0 : index
    %1 = memref.load %arg4[%c0_1] : memref<1xf32, #tpu.memory_space<smem>>
    %c0_2 = arith.constant 0 : index
    %c0_3 = arith.constant 0 : index
    %2 = vector.load %arg1[%c0_2, %c0_3] : memref<128x32xf32, #tpu.memory_space<vmem>>, vector<128x32xf32>
    %cst = arith.constant dense<0.000000e+00> : vector<128x1xf32>
    %3 = tpu.matmul %2, %0, %cst {dimension_numbers = #tpu.dot_dimension_numbers<[1], [0], [0], [1], [0, 0, 1, 1], [], []>} : vector<128x32xf32>, vector<32x1xf32>, vector<128x1xf32> -> vector<128x1xf32>
    %4 = vector.broadcast %1 : f32 to vector<128x1xf32>
    %5 = arith.addf %3, %4 : vector<128x1xf32>
    %c0_4 = arith.constant 0 : index
    %c0_5 = arith.constant 0 : index
    %6 = vector.load %arg5[%c0_4, %c0_5] : memref<128x1xf32, #tpu.memory_space<vmem>>, vector<128x1xf32>
    tpu.vector_store %arg5[%c0_4, %c0_5], %5 {strides = array<i32>} : memref<128x1xf32, #tpu.memory_space<vmem>>, vector<128x1xf32>,
    %c0_6 = arith.constant 0 : index
    %c0_7 = arith.constant 0 : index
    %7 = vector.load %arg2[%c0_6, %c0_7] : memref<128x32xf32, #tpu.memory_space<vmem>>, vector<128x32xf32>
    %cst_8 = arith.constant dense<0.000000e+00> : vector<128x1xf32>
    %8 = tpu.matmul %7, %0, %cst_8 {dimension_numbers = #tpu.dot_dimension_numbers<[1], [0], [0], [1], [0, 0, 1, 1], [], []>} : vector<128x32xf32>, vector<32x1xf32>, vector<128x1xf32> -> vector<128x1xf32>
    %9 = vector.broadcast %1 : f32 to vector<128x1xf32>
    %10 = arith.addf %8, %9 : vector<128x1xf32>
    %c0_9 = arith.constant 0 : index
    %c0_10 = arith.constant 0 : index
    %11 = vector.load %arg6[%c0_9, %c0_10] : memref<128x1xf32, #tpu.memory_space<vmem>>, vector<128x1xf32>
    tpu.vector_store %arg6[%c0_9, %c0_10], %10 {strides = array<i32>} : memref<128x1xf32, #tpu.memory_space<vmem>>, vector<128x1xf32>,
    return
  }
  func.func @transform_0(%arg0: i32) -> (i32, i32) {
    %c0_i32 = arith.constant 0 : i32
    %c0_i32_0 = arith.constant 0 : i32
    return %arg0, %c0_i32 : i32, i32
  }
  func.func @transform_1(%arg0: i32) -> (i32, i32) {
    %c0_i32 = arith.constant 0 : i32
    %c0_i32_0 = arith.constant 0 : i32
    return %arg0, %c0_i32 : i32, i32
  }
  func.func @transform_2(%arg0: i32) -> (i32, i32) {
    %c0_i32 = arith.constant 0 : i32
    %c0_i32_0 = arith.constant 0 : i32
    %c0_i32_1 = arith.constant 0 : i32
    return %c0_i32, %c0_i32_0 : i32, i32
  }
  func.func @transform_3(%arg0: i32) -> i32 {
    %c0_i32 = arith.constant 0 : i32
    %c0_i32_0 = arith.constant 0 : i32
    return %c0_i32 : i32
  }
  func.func @transform_4(%arg0: i32) -> (i32, i32) {
    %c0_i32 = arith.constant 0 : i32
    %c0_i32_0 = arith.constant 0 : i32
    return %arg0, %c0_i32 : i32, i32
  }
  func.func @transform_5(%arg0: i32) -> (i32, i32) {
    %c0_i32 = arith.constant 0 : i32
    %c0_i32_0 = arith.constant 0 : i32
    return %arg0, %c0_i32 : i32, i32
  }
}

</mosaic_0001>

<bundles_post_ra>
// kernel: tpu_custom_call.1
= control target key start
LH: loop header
LB: loop body
LE: loop exit
PB: predicated region body
PF: predicated region fallthrough
CT: control target
= control target key end

     0   :  { %vm42_vm0 = vcmask 261120   ;;  %vm236_vm1 = vcmask 7168   ;;  %s957_s2 = inlined_call_operand.vmem [shape: f32[32,1], index: 2, kind: input, shape index: {}]   ;;  %s958_s0 = inlined_call_operand.vmem [shape: f32[128,32], index: 0, kind: input, shape index: {}]   ;;  %s959_s1 = inlined_call_operand.vmem [shape: f32[128,32], index: 1, kind: input, shape index: {}]   ;;  %s960_s3 = inlined_call_operand.<no memory space> [shape: f32[1], index: 3, kind: input, shape index: {}]   ;;  %s961_s4 = inlined_call_operand.vmem [shape: f32[128,1], index: 4, kind: output, shape index: {0}]   ;;  %s962_s5 = inlined_call_operand.vmem [shape: f32[128,1], index: 5, kind: output, shape index: {1}]  }
   0x1   :  { %v23_v0 = vld [vmem:[%s957_s2 + $0x18] sm:$0xff]  ;;  %v22_v1 = vld [vmem:[%s957_s2 + $0x10] sm:$0xff]  ;;  %v21_v2 = vld [vmem:[%s957_s2 + $0x8] sm:$0xff]  ;;  %v795_v36 = vstv %s960_s3 }
   0x2   :  { %558 = vmatprep.subr.mxu0 %v23_v0  ;;  %590 = vmatprep.subr.mxu1 %v23_v0  ;;  %v20_v3 = vld [vmem:[%s957_s2] sm:$0xff]  ;;  %v26_v6 = vld [vmem:[%s958_s0 + $0x8] sm:$0xff]  ;;  %v27_v8 = vld [vmem:[%s958_s0 + $0x10] sm:$0xff] }
   0x3   :  { %559 = vmatpush3.msra.mxu0 %v23_v0  ;;  %591 = vmatpush3.msra.mxu1 %v23_v0  ;;  %v25_v4 = vld [vmem:[%s958_s0] sm:$0xff]  ;;  %v254_v7 = vld [vmem:[%s959_s1 + $0x8] sm:$0xff]  ;;  %v255_v9 = vld [vmem:[%s959_s1 + $0x10] sm:$0xff] }
   0x4   :  { %560 = vmatprep.subr.mxu0 %v22_v1  ;;  %592 = vmatprep.subr.mxu1 %v22_v1  ;;  %v253_v5 = vld [vmem:[%s959_s1] sm:$0xff]  ;;  %v28_v10 = vld [vmem:[%s958_s0 + $0x18] sm:$0xff]  ;;  %v30_v14 = vld [vmem:[%s958_s0 + $0x28] sm:$0xff] }
   0x5   :  { %561 = vmatpush3.msra.mxu0 %v22_v1  ;;  %593 = vmatpush3.msra.mxu1 %v22_v1  ;;  %v256_v11 = vld [vmem:[%s959_s1 + $0x18] sm:$0xff]  ;;  %v29_v12 = vld [vmem:[%s958_s0 + $0x20] sm:$0xff]  ;;  %v258_v15 = vld [vmem:[%s959_s1 + $0x28] sm:$0xff] }
   0x6   :  { %562 = vmatprep.subr.mxu0 %v21_v2  ;;  %594 = vmatprep.subr.mxu1 %v21_v2  ;;  %v257_v13 = vld [vmem:[%s959_s1 + $0x20] sm:$0xff]  ;;  %v31_v16 = vld [vmem:[%s958_s0 + $0x30] sm:$0xff]  ;;  %v32_v18 = vld [vmem:[%s958_s0 + $0x38] sm:$0xff] }
   0x7   :  { %563 = vmatpush3.msra.mxu0 %v21_v2  ;;  %595 = vmatpush3.msra.mxu1 %v21_v2  ;;  %v259_v17 = vld [vmem:[%s959_s1 + $0x30] sm:$0xff]  ;;  %v260_v19 = vld [vmem:[%s959_s1 + $0x38] sm:$0xff]  ;;  %v33_v20 = vld [vmem:[%s958_s0 + $0x40] sm:$0xff] }
   0x8   :  { %564 = vmatprep.subr.mxu0 %v20_v3  ;;  %596 = vmatprep.subr.mxu1 %v20_v3  ;;  %v261_v21 = vld [vmem:[%s959_s1 + $0x40] sm:$0xff]  ;;  %v34_v22 = vld [vmem:[%s958_s0 + $0x48] sm:$0xff]  ;;  %v35_v24 = vld [vmem:[%s958_s0 + $0x50] sm:$0xff] }
   0x9   :  { %565 = vmatpush3.msra.mxu0 %v20_v3  ;;  %566 = vmatprep.mubr.msk.f32.mxu0 %vm42_vm0, %v25_v4  ;;  %v262_v23 = vld [vmem:[%s959_s1 + $0x48] sm:$0xff]  ;;  %v263_v25 = vld [vmem:[%s959_s1 + $0x50] sm:$0xff]  ;;  %v36_v26 = vld [vmem:[%s958_s0 + $0x58] sm:$0xff] }
   0xa   :  { %597 = vmatpush3.msra.mxu1 %v20_v3  ;;  %598 = vmatprep.mubr.msk.f32.mxu1 %vm42_vm0, %v253_v5  ;;  %v264_v27 = vld [vmem:[%s959_s1 + $0x58] sm:$0xff]  ;;  %v37_v28 = vld [vmem:[%s958_s0 + $0x60] sm:$0xff]  ;;  %v38_v30 = vld [vmem:[%s958_s0 + $0x68] sm:$0xff] }
   0xb   :  { %567 = vmatmul.mubr.msk.f32.vlgmr.msra.gmra.mxu0 %vm42_vm0, %v26_v6  ;;  %599 = vmatmul.mubr.msk.f32.vlgmr.msra.gmra.mxu1 %vm42_vm0, %v254_v7  ;;  %v265_v29 = vld [vmem:[%s959_s1 + $0x60] sm:$0xff]  ;;  %v266_v31 = vld [vmem:[%s959_s1 + $0x68] sm:$0xff]  ;;  %v39_v32 = vld [vmem:[%s958_s0 + $0x70] sm:$0xff] }
   0xc   :  { %569 = vmatprep.mubr.msk.f32.mxu0 %vm42_vm0, %v27_v8  ;;  %601 = vmatprep.mubr.msk.f32.mxu1 %vm42_vm0, %v255_v9  ;;  %v267_v33 = vld [vmem:[%s959_s1 + $0x70] sm:$0xff]  ;;  %v40_v34 = vld [vmem:[%s958_s0 + $0x78] sm:$0xff] }
   0xd   :  { %v268_v35 = vld [vmem:[%s959_s1 + $0x78] sm:$0xff] }
   0xf   :  { %570 = vmatmul.mubr.msk.f32.gmra.mxu0 %vm42_vm0, %v28_v10  ;;  %602 = vmatmul.mubr.msk.f32.gmra.mxu1 %vm42_vm0, %v256_v11 }
  0x10   :  { %572 = vmatprep.mubr.msk.f32.mxu0 %vm42_vm0, %v29_v12  ;;  %604 = vmatprep.mubr.msk.f32.mxu1 %vm42_vm0, %v257_v13 }
  0x13   :  { %573 = vmatmul.mubr.msk.f32.gmra.mxu0 %vm42_vm0, %v30_v14  ;;  %605 = vmatmul.mubr.msk.f32.gmra.mxu1 %vm42_vm0, %v258_v15 }
  0x14   :  { %575 = vmatprep.mubr.msk.f32.mxu0 %vm42_vm0, %v31_v16  ;;  %607 = vmatprep.mubr.msk.f32.mxu1 %vm42_vm0, %v259_v17 }
  0x17   :  { %576 = vmatmul.mubr.msk.f32.gmra.mxu0 %vm42_vm0, %v32_v18  ;;  %608 = vmatmul.mubr.msk.f32.gmra.mxu1 %vm42_vm0, %v260_v19 }
  0x18   :  { %578 = vmatprep.mubr.msk.f32.mxu0 %vm42_vm0, %v33_v20  ;;  %610 = vmatprep.mubr.msk.f32.mxu1 %vm42_vm0, %v261_v21 }
  0x1b   :  { %579 = vmatmul.mubr.msk.f32.gmra.mxu0 %vm42_vm0, %v34_v22  ;;  %611 = vmatmul.mubr.msk.f32.gmra.mxu1 %vm42_vm0, %v262_v23 }
  0x1c   :  { %581 = vmatprep.mubr.msk.f32.mxu0 %vm42_vm0, %v35_v24  ;;  %613 = vmatprep.mubr.msk.f32.mxu1 %vm42_vm0, %v263_v25 }
  0x1f   :  { %582 = vmatmul.mubr.msk.f32.gmra.mxu0 %vm42_vm0, %v36_v26  ;;  %614 = vmatmul.mubr.msk.f32.gmra.mxu1 %vm42_vm0, %v264_v27 }
  0x20   :  { %584 = vmatprep.mubr.msk.f32.mxu0 %vm42_vm0, %v37_v28  ;;  %616 = vmatprep.mubr.msk.f32.mxu1 %vm42_vm0, %v265_v29 }
  0x23   :  { %585 = vmatmul.mubr.msk.f32.gmra.mxu0 %vm42_vm0, %v38_v30  ;;  %617 = vmatmul.mubr.msk.f32.gmra.mxu1 %vm42_vm0, %v266_v31 }
  0x24   :  { %587 = vmatprep.mubr.msk.f32.mxu0 %vm42_vm0, %v39_v32  ;;  %619 = vmatprep.mubr.msk.f32.mxu1 %vm42_vm0, %v267_v33 }
  0x27   :  { %588 = vmatmul.mubr.msk.f32.gmra.mxu0 %vm42_vm0, %v40_v34  ;;  %620 = vmatmul.mubr.msk.f32.gmra.mxu1 %vm42_vm0, %v268_v35 }
  0xcb   :  { %v568_v37 = vpop.f32.mrf.mxu0  ;;  %v600_v38 = vpop.f32.mrf.mxu1 }
  0xcc   :  { %v163_v39 = vadd.f32 %v568_v37, %v795_v36  ;;  %v389_v40 = vadd.f32 %v600_v38, %v795_v36 }
  0xcd   :  { %v157_v41 = vpop.f32.mrf.mxu0  ;;  %v383_v42 = vpop.f32.mrf.mxu1 }
  0xce   :  { %238 = vst.msk [vmem:[%s961_s4 + $0x8] sm:$0xff] %vm236_vm1, %v163_v39  ;;  %463 = vst.msk [vmem:[%s962_s5 + $0x8] sm:$0xff] %vm236_vm1, %v389_v40  ;;  %v158_v43 = vadd.f32 %v157_v41, %v795_v36  ;;  %v384_v44 = vadd.f32 %v383_v42, %v795_v36 }
  0xcf   :  { %v571_v45 = vpop.f32.mrf.mxu0  ;;  %v603_v46 = vpop.f32.mrf.mxu1 }
  0xd0   :  { %237 = vst.msk [vmem:[%s961_s4] sm:$0xff] %vm236_vm1, %v158_v43  ;;  %462 = vst.msk [vmem:[%s962_s5] sm:$0xff] %vm236_vm1, %v384_v44  ;;  %v173_v47 = vadd.f32 %v571_v45, %v795_v36  ;;  %v399_v48 = vadd.f32 %v603_v46, %v795_v36 }
  0xd1   :  { %v167_v49 = vpop.f32.mrf.mxu0  ;;  %v393_v50 = vpop.f32.mrf.mxu1 }
  0xd2   :  { %240 = vst.msk [vmem:[%s961_s4 + $0x18] sm:$0xff] %vm236_vm1, %v173_v47  ;;  %465 = vst.msk [vmem:[%s962_s5 + $0x18] sm:$0xff] %vm236_vm1, %v399_v48  ;;  %v168_v51 = vadd.f32 %v167_v49, %v795_v36  ;;  %v394_v52 = vadd.f32 %v393_v50, %v795_v36 }
  0xd3   :  { %v574_v53 = vpop.f32.mrf.mxu0  ;;  %v606_v54 = vpop.f32.mrf.mxu1 }
  0xd4   :  { %239 = vst.msk [vmem:[%s961_s4 + $0x10] sm:$0xff] %vm236_vm1, %v168_v51  ;;  %464 = vst.msk [vmem:[%s962_s5 + $0x10] sm:$0xff] %vm236_vm1, %v394_v52  ;;  %v183_v55 = vadd.f32 %v574_v53, %v795_v36  ;;  %v409_v56 = vadd.f32 %v606_v54, %v795_v36 }
  0xd5   :  { %v177_v57 = vpop.f32.mrf.mxu0  ;;  %v403_v58 = vpop.f32.mrf.mxu1 }
  0xd6   :  { %242 = vst.msk [vmem:[%s961_s4 + $0x28] sm:$0xff] %vm236_vm1, %v183_v55  ;;  %467 = vst.msk [vmem:[%s962_s5 + $0x28] sm:$0xff] %vm236_vm1, %v409_v56  ;;  %v178_v59 = vadd.f32 %v177_v57, %v795_v36  ;;  %v404_v60 = vadd.f32 %v403_v58, %v795_v36 }
  0xd7   :  { %v577_v61 = vpop.f32.mrf.mxu0  ;;  %v609_v62 = vpop.f32.mrf.mxu1 }
  0xd8   :  { %241 = vst.msk [vmem:[%s961_s4 + $0x20] sm:$0xff] %vm236_vm1, %v178_v59  ;;  %466 = vst.msk [vmem:[%s962_s5 + $0x20] sm:$0xff] %vm236_vm1, %v404_v60  ;;  %v193_v63 = vadd.f32 %v577_v61, %v795_v36  ;;  %v419_v0 = vadd.f32 %v609_v62, %v795_v36 }
  0xd9   :  { %v187_v1 = vpop.f32.mrf.mxu0  ;;  %v413_v2 = vpop.f32.mrf.mxu1 }
  0xda   :  { %244 = vst.msk [vmem:[%s961_s4 + $0x38] sm:$0xff] %vm236_vm1, %v193_v63  ;;  %469 = vst.msk [vmem:[%s962_s5 + $0x38] sm:$0xff] %vm236_vm1, %v419_v0  ;;  %v188_v3 = vadd.f32 %v187_v1, %v795_v36  ;;  %v414_v4 = vadd.f32 %v413_v2, %v795_v36 }
  0xdb   :  { %v580_v5 = vpop.f32.mrf.mxu0  ;;  %v612_v6 = vpop.f32.mrf.mxu1 }
  0xdc   :  { %243 = vst.msk [vmem:[%s961_s4 + $0x30] sm:$0xff] %vm236_vm1, %v188_v3  ;;  %468 = vst.msk [vmem:[%s962_s5 + $0x30] sm:$0xff] %vm236_vm1, %v414_v4  ;;  %v203_v7 = vadd.f32 %v580_v5, %v795_v36  ;;  %v429_v8 = vadd.f32 %v612_v6, %v795_v36 }
  0xdd   :  { %v197_v9 = vpop.f32.mrf.mxu0  ;;  %v423_v10 = vpop.f32.mrf.mxu1 }
  0xde   :  { %246 = vst.msk [vmem:[%s961_s4 + $0x48] sm:$0xff] %vm236_vm1, %v203_v7  ;;  %471 = vst.msk [vmem:[%s962_s5 + $0x48] sm:$0xff] %vm236_vm1, %v429_v8  ;;  %v198_v11 = vadd.f32 %v197_v9, %v795_v36  ;;  %v424_v12 = vadd.f32 %v423_v10, %v795_v36 }
  0xdf   :  { %v583_v13 = vpop.f32.mrf.mxu0  ;;  %v615_v14 = vpop.f32.mrf.mxu1 }
  0xe0   :  { %245 = vst.msk [vmem:[%s961_s4 + $0x40] sm:$0xff] %vm236_vm1, %v198_v11  ;;  %470 = vst.msk [vmem:[%s962_s5 + $0x40] sm:$0xff] %vm236_vm1, %v424_v12  ;;  %v213_v15 = vadd.f32 %v583_v13, %v795_v36  ;;  %v439_v16 = vadd.f32 %v615_v14, %v795_v36 }
  0xe1   :  { %v207_v17 = vpop.f32.mrf.mxu0  ;;  %v433_v18 = vpop.f32.mrf.mxu1 }
  0xe2   :  { %248 = vst.msk [vmem:[%s961_s4 + $0x58] sm:$0xff] %vm236_vm1, %v213_v15  ;;  %473 = vst.msk [vmem:[%s962_s5 + $0x58] sm:$0xff] %vm236_vm1, %v439_v16  ;;  %v208_v19 = vadd.f32 %v207_v17, %v795_v36  ;;  %v434_v20 = vadd.f32 %v433_v18, %v795_v36 }
  0xe3   :  { %v586_v21 = vpop.f32.mrf.mxu0  ;;  %v618_v22 = vpop.f32.mrf.mxu1 }
  0xe4   :  { %247 = vst.msk [vmem:[%s961_s4 + $0x50] sm:$0xff] %vm236_vm1, %v208_v19  ;;  %472 = vst.msk [vmem:[%s962_s5 + $0x50] sm:$0xff] %vm236_vm1, %v434_v20  ;;  %v223_v23 = vadd.f32 %v586_v21, %v795_v36  ;;  %v449_v24 = vadd.f32 %v618_v22, %v795_v36 }
  0xe5   :  { %v217_v25 = vpop.f32.mrf.mxu0  ;;  %v443_v26 = vpop.f32.mrf.mxu1 }
  0xe6   :  { %250 = vst.msk [vmem:[%s961_s4 + $0x68] sm:$0xff] %vm236_vm1, %v223_v23  ;;  %475 = vst.msk [vmem:[%s962_s5 + $0x68] sm:$0xff] %vm236_vm1, %v449_v24  ;;  %v218_v27 = vadd.f32 %v217_v25, %v795_v36  ;;  %v444_v28 = vadd.f32 %v443_v26, %v795_v36 }
  0xe7   :  { %v589_v29 = vpop.f32.mrf.mxu0  ;;  %v621_v30 = vpop.f32.mrf.mxu1 }
  0xe8   :  { %249 = vst.msk [vmem:[%s961_s4 + $0x60] sm:$0xff] %vm236_vm1, %v218_v27  ;;  %474 = vst.msk [vmem:[%s962_s5 + $0x60] sm:$0xff] %vm236_vm1, %v444_v28  ;;  %v233_v31 = vadd.f32 %v589_v29, %v795_v36  ;;  %v459_v32 = vadd.f32 %v621_v30, %v795_v36 }
  0xe9   :  { %v227_v33 = vpop.f32.mrf.mxu0  ;;  %v453_v34 = vpop.f32.mrf.mxu1 }
  0xea   :  { %252 = vst.msk [vmem:[%s961_s4 + $0x78] sm:$0xff] %vm236_vm1, %v233_v31  ;;  %477 = vst.msk [vmem:[%s962_s5 + $0x78] sm:$0xff] %vm236_vm1, %v459_v32  ;;  %v228_v35 = vadd.f32 %v227_v33, %v795_v36  ;;  %v454_v37 = vadd.f32 %v453_v34, %v795_v36 }
  0xec   :  { %251 = vst.msk [vmem:[%s961_s4 + $0x70] sm:$0xff] %vm236_vm1, %v228_v35  ;;  %476 = vst.msk [vmem:[%s962_s5 + $0x70] sm:$0xff] %vm236_vm1, %v454_v37 }

</bundles_post_ra>
